<compile_context>
chip_gen: v5e
topology: v5e:2x2
jax: 0.10.0
libtpu: 0.0.40
codegen_flags: <defaults>
</compile_context>

<pallas_src>
import jax
import jax.numpy as jnp
from jax import lax
from jax.experimental import pallas as pl
from jax.experimental.pallas import tpu as pltpu

# ------------------------------- configuration -------------------------------------
B = 2                        # batch
FREQ_RES = 64                # freq_res (module default 256; small here)
SAMPLE_RES = 21              # sample_res (module default kernel length, odd)
N_SRC = 2                    # n_sources
STRIDE = SAMPLE_RES // 2     # 10 = conv stride = conv padding = deconv stride/padding
PAD = SAMPLE_RES // 2        # 10
OUT_PAD = STRIDE - 1         # ConvTranspose1d output_padding = sample_res//2 - 1
T_SAMPLES = 1280             # waveform length, chosen so n_frames == 128 (lane-dense)
TP = (T_SAMPLES + 2 * PAD - SAMPLE_RES) // STRIDE + 1        # 128 encoded frames
L_OUT = (TP - 1) * STRIDE - 2 * PAD + SAMPLE_RES + OUT_PAD   # 1280 == TP * STRIDE

# Decoder taps are stored transposed & regrouped into sublane-aligned row groups:
#   rows [ROW_MID, ROW_MID+STRIDE) : taps k = STRIDE..2*STRIDE-1  -> contribute at frame q
#   rows [ROW_LO , ROW_LO +STRIDE) : taps k = 0..STRIDE-1         -> contribute at frame q+1
#   row   ROW_HI                   : tap  k = 2*STRIDE            -> contribute at frame q-1 (phase j==0)
ROW_MID, ROW_LO, ROW_HI = 0, 16, 32
KP = 40                      # padded decoder row count (multiple of 8)

assert SAMPLE_RES == 2 * STRIDE + 1
assert L_OUT == TP * STRIDE


# ------------------------------- fused forward kernel ------------------------------
def _fused_fwd_kernel(p_ref, we_ref, be_ref, wdT_ref, bd_ref, masks_ref, z_ref):
    # p_ref    : [K, (1+S)*TP]  im2col patches (stream 0 = mixture, streams 1..S = sources)
    # we_ref   : [F, K]         encoder Conv1d weight
    # be_ref   : [F, 1]         encoder Conv1d bias
    # wdT_ref  : [S, KP, F]     decoder taps, transposed + regrouped (see above)
    # bd_ref   : [S]            decoder bias (SMEM scalars)
    # masks_ref: [S, F, TP]     OUT: softmax target masks
    # z_ref    : [S, STRIDE, TP] OUT: reconstruction in (phase j, frame q) layout

    # --- adaptive encoder (Conv1d + ReLU) for mixture AND all sources: one MXU push
    enc = jnp.maximum(
        jnp.dot(we_ref[...], p_ref[...], preferred_element_type=jnp.float32)
        + be_ref[...], 0.0)                                   # [F, (1+S)*TP]
    enc_mix = enc[:, 0:TP]                                    # encoded mixture [F, TP]
    logits = [enc[:, (1 + s) * TP:(2 + s) * TP] for s in range(N_SRC)]

    # --- softmax over the source axis (ideal target masks)
    mx = logits[0]
    for s in range(1, N_SRC):
        mx = jnp.maximum(mx, logits[s])
    exps = [jnp.exp(l - mx) for l in logits]
    den = exps[0]
    for s in range(1, N_SRC):
        den = den + exps[s]
    inv = 1.0 / den

    # --- hoisted helpers for the in-kernel overlap-add (shared across sources)
    p_i = lax.broadcasted_iota(jnp.int32, (TP, TP), 0)
    q_i = lax.broadcasted_iota(jnp.int32, (TP, TP), 1)
    # (X @ m_next)[:, q] = X[:, q+1] (0 at q=TP-1);  (X @ m_prev)[:, q] = X[:, q-1] (0 at q=0)
    m_next = jnp.where(p_i == q_i + 1, 1.0, 0.0)
    m_prev = jnp.where(p_i + 1 == q_i, 1.0, 0.0)
    row0 = lax.broadcasted_iota(jnp.int32, (STRIDE, TP), 0) == 0

    for s in range(N_SRC):                                    # static loop, S = 2
        mask_s = exps[s] * inv                                # [F, TP]
        masks_ref[s] = mask_s
        masked_s = mask_s * enc_mix                           # masked encoded mixture
        # grouped ConvTranspose1d, group s: tap responses C[r, q] = sum_f wdT[r,f]*masked[f,q]
        c = jnp.dot(wdT_ref[s], masked_s, preferred_element_type=jnp.float32)   # [KP, TP]
        mid = c[ROW_MID:ROW_MID + STRIDE, :]                  # taps STRIDE+j  at frame q
        lo = c[ROW_LO:ROW_LO + STRIDE, :]                     # taps j         at frame q+1
        hi = c[ROW_HI:ROW_HI + 1, :]                          # tap  2*STRIDE  at frame q-1
        lo_next = jnp.dot(lo, m_next, preferred_element_type=jnp.float32)
        hi_prev = jnp.dot(hi, m_prev, preferred_element_type=jnp.float32)
        # output sample tau = q*STRIDE + j  (cropped by `padding` on the left already)
        z_ref[s] = mid + lo_next + jnp.where(row0, hi_prev, 0.0) + bd_ref[s]


# --------------------------------- wrapper ------------------------------------------
def adaptive_encoder_decoder_forward(mixture, clean_sources, params):
    """AdaptiveEncoderDecoder.forward -> (recon_sources [B,S,L_OUT], enc_masks [B,S,F,TP])."""
    w_enc, b_enc = params["w_enc"], params["b_enc"]           # [F, K], [F, 1]
    w_dec, b_dec = params["w_dec"], params["b_dec"]           # [S, F, K], [S]
    Bsz, T = mixture.shape
    S = clean_sources.shape[1]
    F = w_enc.shape[0]
    assert S == N_SRC and T == T_SAMPLES

    # im2col framing of mixture + sources (pure data-movement glue)
    waves = jnp.concatenate([mixture[:, None, :], clean_sources], axis=1)     # [B, 1+S, T]
    waves = jnp.pad(waves, ((0, 0), (0, 0), (PAD, PAD)))
    idx = jnp.arange(TP)[None, :] * STRIDE + jnp.arange(SAMPLE_RES)[:, None]  # [K, TP]
    patches = waves[:, :, idx]                                                # [B,1+S,K,TP]
    patches = jnp.transpose(patches, (0, 2, 1, 3)).reshape(Bsz, SAMPLE_RES, (1 + S) * TP)

    # decoder taps transposed & regrouped into sublane-aligned row groups
    wdT = jnp.zeros((S, KP, F), jnp.float32)
    wdT = wdT.at[:, ROW_MID:ROW_MID + STRIDE, :].set(
        jnp.transpose(w_dec[:, :, STRIDE:2 * STRIDE], (0, 2, 1)))
    wdT = wdT.at[:, ROW_LO:ROW_LO + STRIDE, :].set(
        jnp.transpose(w_dec[:, :, 0:STRIDE], (0, 2, 1)))
    wdT = wdT.at[:, ROW_HI, :].set(w_dec[:, :, 2 * STRIDE])

    masks, z = pl.pallas_call(
        _fused_fwd_kernel,
        out_shape=(jax.ShapeDtypeStruct((Bsz, S, F, TP), jnp.float32),
                   jax.ShapeDtypeStruct((Bsz, S, STRIDE, TP), jnp.float32)),
        grid=(Bsz,),
        in_specs=[
            pl.BlockSpec((None, SAMPLE_RES, (1 + S) * TP), lambda b: (b, 0, 0)),
            # weights: constant block index -> fetched once, not per batch step
            pl.BlockSpec((F, SAMPLE_RES), lambda b: (0, 0)),
            pl.BlockSpec((F, 1), lambda b: (0, 0)),
            pl.BlockSpec((S, KP, F), lambda b: (0, 0, 0)),
            pl.BlockSpec(memory_space=pltpu.MemorySpace.SMEM),   # decoder bias scalars
        ],
        out_specs=(
            pl.BlockSpec((None, S, F, TP), lambda b: (b, 0, 0, 0)),
            pl.BlockSpec((None, S, STRIDE, TP), lambda b: (b, 0, 0, 0)),
        ),
        compiler_params=pltpu.CompilerParams(
            dimension_semantics=("parallel",)),   # batch across the 2 TensorCores on v7x
    )(patches, w_enc, b_enc, wdT, b_dec)

    # (phase j, frame q) -> sample tau = q*STRIDE + j   (tiny layout glue)
    recon = jnp.transpose(z, (0, 1, 3, 2)).reshape(Bsz, S, TP * STRIDE)
    return recon, masks


# --------------------------- pure-JAX reference (for checking) ---------------------
def _ref_forward(mixture, clean_sources, params):
    """Direct per-tap overlap-add formulation of the same module (XLA only)."""
    w_enc, b_enc = params["w_enc"], params["b_enc"]
    w_dec, b_dec = params["w_dec"], params["b_dec"]
    Bsz = mixture.shape[0]
    S = clean_sources.shape[1]
    hp = jax.lax.Precision.HIGHEST
    waves = jnp.concatenate([mixture[:, None, :], clean_sources], axis=1)
    waves = jnp.pad(waves, ((0, 0), (0, 0), (PAD, PAD)))
    idx = jnp.arange(TP)[None, :] * STRIDE + jnp.arange(SAMPLE_RES)[:, None]
    patches = waves[:, :, idx]                                                # [B,1+S,K,TP]
    enc = jax.nn.relu(jnp.einsum("fk,bckt->bcft", w_enc, patches, precision=hp)
                      + b_enc[None, None, :, :])
    enc_mix = enc[:, 0]
    masks = jax.nn.softmax(enc[:, 1:], axis=1)
    masked = masks * enc_mix[:, None]
    full = jnp.zeros((Bsz, S, (TP - 1) * STRIDE + SAMPLE_RES), jnp.float32)
    for k in range(SAMPLE_RES):
        tap = jnp.einsum("bsft,sf->bst", masked, w_dec[:, :, k], precision=hp)
        full = full.at[:, :, k:k + (TP - 1) * STRIDE + 1:STRIDE].add(tap)
    recon = full[:, :, PAD:PAD + L_OUT] + b_dec[None, :, None]
    return recon, masks


# -------------------------------------- main ---------------------------------------
if __name__ == "__main__":
    key = jax.random.PRNGKey(0)
    k1, k2, k3, k4, k5, k6 = jax.random.split(key, 6)
    params = {
        "w_enc": 0.3 * jax.random.normal(k1, (FREQ_RES, SAMPLE_RES), jnp.float32),
        "b_enc": 0.1 * jax.random.normal(k2, (FREQ_RES, 1), jnp.float32),
        "w_dec": 0.2 * jax.random.normal(k3, (N_SRC, FREQ_RES, SAMPLE_RES), jnp.float32),
        "b_dec": 0.1 * jax.random.normal(k4, (N_SRC,), jnp.float32),
    }
    mixture = jax.random.normal(k5, (B, T_SAMPLES), jnp.float32)
    clean_sources = jax.random.normal(k6, (B, N_SRC, T_SAMPLES), jnp.float32)

    recon, masks = jax.jit(adaptive_encoder_decoder_forward)(mixture, clean_sources, params)
    jax.block_until_ready((recon, masks))

    assert recon.shape == (B, N_SRC, L_OUT), recon.shape
    assert masks.shape == (B, N_SRC, FREQ_RES, TP), masks.shape
    assert bool(jnp.all(jnp.isfinite(recon))) and bool(jnp.all(jnp.isfinite(masks)))
    # masks are a softmax over the source axis
    assert float(jnp.max(jnp.abs(jnp.sum(masks, axis=1) - 1.0))) < 1e-3

    r_recon, r_masks = _ref_forward(mixture, clean_sources, params)
    assert float(jnp.max(jnp.abs(recon - r_recon))) < 5e-2, \
        float(jnp.max(jnp.abs(recon - r_recon)))
    assert float(jnp.max(jnp.abs(masks - r_masks))) < 5e-2, \
        float(jnp.max(jnp.abs(masks - r_masks)))

    print("KERNEL_OK")
</pallas_src>

<mosaic_0001>
module attributes {stable_mosaic.version = 11 : i64} {
  func.func @_fused_fwd_kernel(%arg0: i32, %arg1: memref<1x21x384xf32, #tpu.memory_space<vmem>>, %arg2: memref<64x21xf32, #tpu.memory_space<vmem>>, %arg3: memref<64x1xf32, #tpu.memory_space<vmem>>, %arg4: memref<2x40x64xf32, #tpu.memory_space<vmem>>, %arg5: memref<2xf32, #tpu.memory_space<smem>>, %arg6: memref<1x2x64x128xf32, #tpu.memory_space<vmem>>, %arg7: memref<1x2x10x128xf32, #tpu.memory_space<vmem>>) attributes {dimension_semantics = [#tpu.dimension_semantics<parallel>], iteration_bounds = array<i64: 2>, scalar_prefetch = 0 : i64, scratch_operands = 0 : i64, tpu.core_type = #tpu.core_type<tc>, window_params = [{transform_indices = @transform_0, window_bounds = array<i64: 1, 21, 384>}, {pipeline_mode = #tpu.pipeline_mode<synchronous>, transform_indices = @transform_1, window_bounds = array<i64: 64, 21>}, {pipeline_mode = #tpu.pipeline_mode<synchronous>, transform_indices = @transform_2, window_bounds = array<i64: 64, 1>}, {pipeline_mode = #tpu.pipeline_mode<synchronous>, transform_indices = @transform_3, window_bounds = array<i64: 2, 40, 64>}, {transform_indices = @transform_4, window_bounds = array<i64: 2>}, {transform_indices = @transform_5, window_bounds = array<i64: 1, 2, 64, 128>}, {transform_indices = @transform_6, window_bounds = array<i64: 1, 2, 10, 128>}]} {
    %c0 = arith.constant 0 : index
    %c0_0 = arith.constant 0 : index
    %0 = vector.load %arg2[%c0, %c0_0] : memref<64x21xf32, #tpu.memory_space<vmem>>, vector<64x21xf32>
    %c0_1 = arith.constant 0 : index
    %c0_2 = arith.constant 0 : index
    %c0_3 = arith.constant 0 : index
    %1 = vector.load %arg1[%c0_1, %c0_2, %c0_3] : memref<1x21x384xf32, #tpu.memory_space<vmem>>, vector<1x21x384xf32>
    %2 = vector.shape_cast %1 : vector<1x21x384xf32> to vector<21x384xf32>
    %cst = arith.constant dense<0.000000e+00> : vector<64x384xf32>
    %3 = tpu.matmul %0, %2, %cst {dimension_numbers = #tpu.dot_dimension_numbers<[1], [0], [0], [1], [0, 0, 1, 1], [], []>} : vector<64x21xf32>, vector<21x384xf32>, vector<64x384xf32> -> vector<64x384xf32>
    %c0_4 = arith.constant 0 : index
    %c0_5 = arith.constant 0 : index
    %4 = vector.load %arg3[%c0_4, %c0_5] : memref<64x1xf32, #tpu.memory_space<vmem>>, vector<64x1xf32>
    %5 = vector.broadcast %4 : vector<64x1xf32> to vector<64x384xf32>
    %6 = arith.addf %3, %5 : vector<64x384xf32>
    %cst_6 = arith.constant 0.000000e+00 : f32
    %7 = vector.broadcast %cst_6 : f32 to vector<64x384xf32>
    %8 = arith.maximumf %6, %7 : vector<64x384xf32>
    %9 = vector.extract_strided_slice %8 {offsets = [0, 0], sizes = [64, 128], strides = [1, 1]} : vector<64x384xf32> to vector<64x128xf32>
    %10 = vector.extract_strided_slice %8 {offsets = [0, 128], sizes = [64, 128], strides = [1, 1]} : vector<64x384xf32> to vector<64x128xf32>
    %11 = vector.extract_strided_slice %8 {offsets = [0, 256], sizes = [64, 128], strides = [1, 1]} : vector<64x384xf32> to vector<64x128xf32>
    %12 = arith.maximumf %10, %11 : vector<64x128xf32>
    %13 = arith.subf %10, %12 : vector<64x128xf32>
    %14 = math.exp %13 : vector<64x128xf32>
    %15 = arith.subf %11, %12 : vector<64x128xf32>
    %16 = math.exp %15 : vector<64x128xf32>
    %17 = arith.addf %14, %16 : vector<64x128xf32>
    %cst_7 = arith.constant 1.000000e+00 : f32
    %18 = vector.broadcast %cst_7 : f32 to vector<64x128xf32>
    %19 = arith.divf %18, %17 : vector<64x128xf32>
    %20 = tpu.iota {dimensions = array<i32: 0>} : vector<128x128xi32>
    %21 = tpu.iota {dimensions = array<i32: 1>} : vector<128x128xi32>
    %c1_i32 = arith.constant 1 : i32
    %22 = vector.broadcast %c1_i32 : i32 to vector<128x128xi32>
    %23 = arith.addi %21, %22 : vector<128x128xi32>
    %24 = arith.cmpi eq, %20, %23 : vector<128x128xi32>
    %cst_8 = arith.constant 1.000000e+00 : f32
    %cst_9 = arith.constant 0.000000e+00 : f32
    %25 = vector.broadcast %cst_8 : f32 to vector<128x128xf32>
    %26 = vector.broadcast %cst_9 : f32 to vector<128x128xf32>
    %27 = arith.select %24, %25, %26 : vector<128x128xi1>, vector<128x128xf32>
    %c1_i32_10 = arith.constant 1 : i32
    %28 = vector.broadcast %c1_i32_10 : i32 to vector<128x128xi32>
    %29 = arith.addi %20, %28 : vector<128x128xi32>
    %30 = arith.cmpi eq, %29, %21 : vector<128x128xi32>
    %cst_11 = arith.constant 1.000000e+00 : f32
    %cst_12 = arith.constant 0.000000e+00 : f32
    %31 = vector.broadcast %cst_11 : f32 to vector<128x128xf32>
    %32 = vector.broadcast %cst_12 : f32 to vector<128x128xf32>
    %33 = arith.select %30, %31, %32 : vector<128x128xi1>, vector<128x128xf32>
    %34 = tpu.iota {dimensions = array<i32: 0>} : vector<10x128xi32>
    %c0_i32 = arith.constant 0 : i32
    %35 = vector.broadcast %c0_i32 : i32 to vector<10x128xi32>
    %36 = arith.cmpi eq, %34, %35 : vector<10x128xi32>
    %37 = arith.mulf %14, %19 : vector<64x128xf32>
    %c0_13 = arith.constant 0 : index
    %c0_14 = arith.constant 0 : index
    %c0_15 = arith.constant 0 : index
    %c0_16 = arith.constant 0 : index
    %38 = vector.load %arg6[%c0_13, %c0_14, %c0_15, %c0_16] : memref<1x2x64x128xf32, #tpu.memory_space<vmem>>, vector<1x1x64x128xf32>
    %39 = vector.shape_cast %38 : vector<1x1x64x128xf32> to vector<64x128xf32>
    %40 = vector.shape_cast %37 : vector<64x128xf32> to vector<1x1x64x128xf32>
    tpu.vector_store %arg6[%c0_13, %c0_14, %c0_15, %c0_16], %40 {strides = array<i32>} : memref<1x2x64x128xf32, #tpu.memory_space<vmem>>, vector<1x1x64x128xf32>,
    %41 = arith.mulf %37, %9 : vector<64x128xf32>
    %c0_17 = arith.constant 0 : index
    %c0_18 = arith.constant 0 : index
    %c0_19 = arith.constant 0 : index
    %42 = vector.load %arg4[%c0_17, %c0_18, %c0_19] : memref<2x40x64xf32, #tpu.memory_space<vmem>>, vector<1x40x64xf32>
    %43 = vector.shape_cast %42 : vector<1x40x64xf32> to vector<40x64xf32>
    %cst_20 = arith.constant dense<0.000000e+00> : vector<40x128xf32>
    %44 = tpu.matmul %43, %41, %cst_20 {dimension_numbers = #tpu.dot_dimension_numbers<[1], [0], [0], [1], [0, 0, 1, 1], [], []>} : vector<40x64xf32>, vector<64x128xf32>, vector<40x128xf32> -> vector<40x128xf32>
    %45 = vector.extract_strided_slice %44 {offsets = [0, 0], sizes = [10, 128], strides = [1, 1]} : vector<40x128xf32> to vector<10x128xf32>
    %46 = vector.extract_strided_slice %44 {offsets = [16, 0], sizes = [10, 128], strides = [1, 1]} : vector<40x128xf32> to vector<10x128xf32>
    %47 = vector.extract_strided_slice %44 {offsets = [32, 0], sizes = [1, 128], strides = [1, 1]} : vector<40x128xf32> to vector<1x128xf32>
    %cst_21 = arith.constant dense<0.000000e+00> : vector<10x128xf32>
    %48 = tpu.matmul %46, %27, %cst_21 {dimension_numbers = #tpu.dot_dimension_numbers<[1], [0], [0], [1], [0, 0, 1, 1], [], []>} : vector<10x128xf32>, vector<128x128xf32>, vector<10x128xf32> -> vector<10x128xf32>
    %cst_22 = arith.constant dense<0.000000e+00> : vector<1x128xf32>
    %49 = tpu.matmul %47, %33, %cst_22 {dimension_numbers = #tpu.dot_dimension_numbers<[1], [0], [0], [1], [0, 0, 1, 1], [], []>} : vector<1x128xf32>, vector<128x128xf32>, vector<1x128xf32> -> vector<1x128xf32>
    %50 = arith.addf %45, %48 : vector<10x128xf32>
    %cst_23 = arith.constant 0.000000e+00 : f32
    %51 = vector.shape_cast %49 : vector<1x128xf32> to vector<1x128xf32>
    %52 = vector.broadcast %51 : vector<1x128xf32> to vector<10x128xf32>
    %53 = vector.broadcast %cst_23 : f32 to vector<10x128xf32>
    %54 = arith.select %36, %52, %53 : vector<10x128xi1>, vector<10x128xf32>
    %55 = arith.addf %50, %54 : vector<10x128xf32>
    %c0_24 = arith.constant 0 : index
    %56 = memref.load %arg5[%c0_24] : memref<2xf32, #tpu.memory_space<smem>>
    %57 = vector.broadcast %56 : f32 to vector<10x128xf32>
    %58 = arith.addf %55, %57 : vector<10x128xf32>
    %c0_25 = arith.constant 0 : index
    %c0_26 = arith.constant 0 : index
    %c0_27 = arith.constant 0 : index
    %c0_28 = arith.constant 0 : index
    %59 = vector.load %arg7[%c0_25, %c0_26, %c0_27, %c0_28] : memref<1x2x10x128xf32, #tpu.memory_space<vmem>>, vector<1x1x10x128xf32>
    %60 = vector.shape_cast %59 : vector<1x1x10x128xf32> to vector<10x128xf32>
    %61 = vector.shape_cast %58 : vector<10x128xf32> to vector<1x1x10x128xf32>
    tpu.vector_store %arg7[%c0_25, %c0_26, %c0_27, %c0_28], %61 {strides = array<i32>} : memref<1x2x10x128xf32, #tpu.memory_space<vmem>>, vector<1x1x10x128xf32>,
    %62 = arith.mulf %16, %19 : vector<64x128xf32>
    %c0_29 = arith.constant 0 : index
    %c1 = arith.constant 1 : index
    %c0_30 = arith.constant 0 : index
    %c0_31 = arith.constant 0 : index
    %63 = vector.load %arg6[%c0_29, %c1, %c0_30, %c0_31] : memref<1x2x64x128xf32, #tpu.memory_space<vmem>>, vector<1x1x64x128xf32>
    %64 = vector.shape_cast %63 : vector<1x1x64x128xf32> to vector<64x128xf32>
    %65 = vector.shape_cast %62 : vector<64x128xf32> to vector<1x1x64x128xf32>
    tpu.vector_store %arg6[%c0_29, %c1, %c0_30, %c0_31], %65 {strides = array<i32>} : memref<1x2x64x128xf32, #tpu.memory_space<vmem>>, vector<1x1x64x128xf32>,
    %66 = arith.mulf %62, %9 : vector<64x128xf32>
    %c1_32 = arith.constant 1 : index
    %c0_33 = arith.constant 0 : index
    %c0_34 = arith.constant 0 : index
    %67 = vector.load %arg4[%c1_32, %c0_33, %c0_34] : memref<2x40x64xf32, #tpu.memory_space<vmem>>, vector<1x40x64xf32>
    %68 = vector.shape_cast %67 : vector<1x40x64xf32> to vector<40x64xf32>
    %cst_35 = arith.constant dense<0.000000e+00> : vector<40x128xf32>
    %69 = tpu.matmul %68, %66, %cst_35 {dimension_numbers = #tpu.dot_dimension_numbers<[1], [0], [0], [1], [0, 0, 1, 1], [], []>} : vector<40x64xf32>, vector<64x128xf32>, vector<40x128xf32> -> vector<40x128xf32>
    %70 = vector.extract_strided_slice %69 {offsets = [0, 0], sizes = [10, 128], strides = [1, 1]} : vector<40x128xf32> to vector<10x128xf32>
    %71 = vector.extract_strided_slice %69 {offsets = [16, 0], sizes = [10, 128], strides = [1, 1]} : vector<40x128xf32> to vector<10x128xf32>
    %72 = vector.extract_strided_slice %69 {offsets = [32, 0], sizes = [1, 128], strides = [1, 1]} : vector<40x128xf32> to vector<1x128xf32>
    %cst_36 = arith.constant dense<0.000000e+00> : vector<10x128xf32>
    %73 = tpu.matmul %71, %27, %cst_36 {dimension_numbers = #tpu.dot_dimension_numbers<[1], [0], [0], [1], [0, 0, 1, 1], [], []>} : vector<10x128xf32>, vector<128x128xf32>, vector<10x128xf32> -> vector<10x128xf32>
    %cst_37 = arith.constant dense<0.000000e+00> : vector<1x128xf32>
    %74 = tpu.matmul %72, %33, %cst_37 {dimension_numbers = #tpu.dot_dimension_numbers<[1], [0], [0], [1], [0, 0, 1, 1], [], []>} : vector<1x128xf32>, vector<128x128xf32>, vector<1x128xf32> -> vector<1x128xf32>
    %75 = arith.addf %70, %73 : vector<10x128xf32>
    %cst_38 = arith.constant 0.000000e+00 : f32
    %76 = vector.shape_cast %74 : vector<1x128xf32> to vector<1x128xf32>
    %77 = vector.broadcast %76 : vector<1x128xf32> to vector<10x128xf32>
    %78 = vector.broadcast %cst_38 : f32 to vector<10x128xf32>
    %79 = arith.select %36, %77, %78 : vector<10x128xi1>, vector<10x128xf32>
    %80 = arith.addf %75, %79 : vector<10x128xf32>
    %c1_39 = arith.constant 1 : index
    %81 = memref.load %arg5[%c1_39] : memref<2xf32, #tpu.memory_space<smem>>
    %82 = vector.broadcast %81 : f32 to vector<10x128xf32>
    %83 = arith.addf %80, %82 : vector<10x128xf32>
    %c0_40 = arith.constant 0 : index
    %c1_41 = arith.constant 1 : index
    %c0_42 = arith.constant 0 : index
    %c0_43 = arith.constant 0 : index
    %84 = vector.load %arg7[%c0_40, %c1_41, %c0_42, %c0_43] : memref<1x2x10x128xf32, #tpu.memory_space<vmem>>, vector<1x1x10x128xf32>
    %85 = vector.shape_cast %84 : vector<1x1x10x128xf32> to vector<10x128xf32>
    %86 = vector.shape_cast %83 : vector<10x128xf32> to vector<1x1x10x128xf32>
    tpu.vector_store %arg7[%c0_40, %c1_41, %c0_42, %c0_43], %86 {strides = array<i32>} : memref<1x2x10x128xf32, #tpu.memory_space<vmem>>, vector<1x1x10x128xf32>,
    return
  }
  func.func @transform_0(%arg0: i32) -> (i32, i32, i32) {
    %c0_i32 = arith.constant 0 : i32
    %c0_i32_0 = arith.constant 0 : i32
    %c0_i32_1 = arith.constant 0 : i32
    return %arg0, %c0_i32, %c0_i32_0 : i32, i32, i32
  }
  func.func @transform_1(%arg0: i32) -> (i32, i32) {
    %c0_i32 = arith.constant 0 : i32
    %c0_i32_0 = arith.constant 0 : i32
    %c0_i32_1 = arith.constant 0 : i32
    return %c0_i32, %c0_i32_0 : i32, i32
  }
  func.func @transform_2(%arg0: i32) -> (i32, i32) {
    %c0_i32 = arith.constant 0 : i32
    %c0_i32_0 = arith.constant 0 : i32
    %c0_i32_1 = arith.constant 0 : i32
    return %c0_i32, %c0_i32_0 : i32, i32
  }
  func.func @transform_3(%arg0: i32) -> (i32, i32, i32) {
    %c0_i32 = arith.constant 0 : i32
    %c0_i32_0 = arith.constant 0 : i32
    %c0_i32_1 = arith.constant 0 : i32
    %c0_i32_2 = arith.constant 0 : i32
    return %c0_i32, %c0_i32_0, %c0_i32_1 : i32, i32, i32
  }
  func.func @transform_4(%arg0: i32) -> i32 {
    %c0_i32 = arith.constant 0 : i32
    %c0_i32_0 = arith.constant 0 : i32
    return %c0_i32 : i32
  }
  func.func @transform_5(%arg0: i32) -> (i32, i32, i32, i32) {
    %c0_i32 = arith.constant 0 : i32
    %c0_i32_0 = arith.constant 0 : i32
    %c0_i32_1 = arith.constant 0 : i32
    %c0_i32_2 = arith.constant 0 : i32
    return %arg0, %c0_i32, %c0_i32_0, %c0_i32_1 : i32, i32, i32, i32
  }
  func.func @transform_6(%arg0: i32) -> (i32, i32, i32, i32) {
    %c0_i32 = arith.constant 0 : i32
    %c0_i32_0 = arith.constant 0 : i32
    %c0_i32_1 = arith.constant 0 : i32
    %c0_i32_2 = arith.constant 0 : i32
    return %arg0, %c0_i32, %c0_i32_0, %c0_i32_1 : i32, i32, i32, i32
  }
}

</mosaic_0001>

<bundles_post_ra>
// kernel: adaptive_encoder_decoder_forward.1
= control target key start
LH: loop header
LB: loop body
LE: loop exit
PB: predicated region body
PF: predicated region fallthrough
CT: control target
= control target key end

     0   :  { %12 = vsyncpa [#allocation4], 0  ;;  %s2389_s0 = inlined_call_operand.vmem [shape: f32[2,21,384], index: 0, kind: input, shape index: {}]   ;;  %s2390_s1 = inlined_call_operand.vmem [shape: f32[64,21], index: 1, kind: input, shape index: {}]   ;;  %s2391_s2 = inlined_call_operand.vmem [shape: f32[64,1], index: 2, kind: input, shape index: {}]   ;;  %s2392_s3 = inlined_call_operand.vmem [shape: f32[2,40,64], index: 3, kind: input, shape index: {}]   ;;  %s2393_s4 = inlined_call_operand.vmem [shape: f32[2], index: 4, kind: input, shape index: {}]   ;;  %s2394_s5 = inlined_call_operand.hbm [shape: f32[2,2,64,128], index: 5, kind: output, shape index: {0}]   ;;  %s2395_s6 = inlined_call_operand.vmem [shape: f32[2,2,10,128], index: 6, kind: output, shape index: {1}]  }
   0x1   :  { %13 = vsyncpa [#allocation3], 0 }
   0x2   :  { %15 = vsyncpa [#allocation3 + $0x1], 0  ;;  %s1575_s21 = smov 0   ;;  %s1577_s22 = smov 0  }
   0x3   :  { %s1579_s23 = smov 0   ;;  %s1581_s24 = smov 0  }
   0x4 LB: > { %s1596_s25 = sadd.s32 4294967295, %s1533_s24   ;;  %s1201_s26 = sadd.s32 4294967294, %s1533_s24   ;;  %s1533_s24 = sphi %s1581_s24, %s2470_s24   ;;  %s1529_s23 = sphi %s1579_s23, %s2469_s23   ;;  %s1525_s22 = sphi %s1577_s22, %s2468_s22   ;;  %s1521_s21 = sphi %s1575_s21, %s2467_s21  }
   0x5   : > { %s1600_s27 = sadd.s32 1, %s1533_s24   ;;  %s138_s28 = sadd.s32 1, %s1529_s23 }
   0x6   : > { %s135_s29 = ssub.s32 %s1533_s24, %s1600_s27  ;;  %p148_p0 = scmp.ne.s32.totalorder %s1529_s23, %s1525_s22 }
   0x7   : > { %p136_p1 = scmp.eq.s32.totalorder %s135_s29, 0  ;;  %p149_p2 = scmp.eq.s32.totalorder %s1596_s25, 1 }
   0x8   : > { %p154_p3 = scmp.ne.s32.totalorder %s1525_s22, %s1521_s21  ;;  %p155_p4 = scmp.eq.s32.totalorder %s1201_s26, 1 }
   0x9   : > { %s1611_s30 = scalar_select %p136_p1, %s1529_s23, %s138_s28  }
   0xa   : > { %p1613_p5 = por %p149_p2, %p148_p0  ;;  %p1617_p6 = por %p155_p4, %p154_p3 }
   0xb   : > { %p1202_p7 = scmp.ge.s32.totalorder %s1533_s24, 1  ;;  %p188_p8 = scmp.lt.s32.totalorder %s1533_s24, 3 }
   0xc   : > { %p1361_p9 = scmp.eq.s32.totalorder %s1596_s25, 0  ;;  %s209_s11 = sshll.u32 %s2393_s4, 4  ;;  %s210_s11 = int_to_ptr.vmem [resolvable:$true] %s209_s11 }
   0xd   : > { %p189_p10 = pnand %p1202_p7, %p188_p8  ;;  %s1535_s12 = smov [#allocation2]  }
   0xf   : > { %p1353_p11 = pneg %p189_p10  ;;  %230 = sbr.rel (%p189_p10) target bundleno = 602 (0x25a), region = 40 }
  0x11   : > { %p1354_p12 = pnand %p1361_p9, %p1353_p11 }
  0x13   : > { %1356 = dma.vmem_to_smem (!%p1354_p12), %s210_s11, 16, %s1535_s12, [#allocation4]  }
  0x14   : > { %1512 = dma.done.wait (%p1361_p9), [#allocation4], 16  }
  0x15   : > { %1514 = vsyncadd (%p1361_p9), [#allocation4], 4294967280 }
  0x16   : > { %237 = sfence }
  0x17   : > { %p267_p13 = scmp.lt.s32.totalorder %s1596_s25, 1  ;;  %v1536_v0 = vmov 0   ;;  %v299_v1 = vld [vmem:[%s2391_s2 + $0x28] sm:$0xff]  ;;  %v301_v2 = vld [vmem:[%s2391_s2 + $0x38] sm:$0xff]  ;;  %vm367_vm0 = vcmask 1044480   ;;  %v298_v5 = vld [vmem:[%s2391_s2 + $0x20] sm:$0xff] }
  0x18   : > { %1402 = vset.pattern.permute.xlu1 %v1536_v0  ;;  %1401 = vset.pattern.permute.xlu0 %v1536_v0  ;;  %v284_v9 = vld [vmem:[%s2390_s1 + $0x38] sm:$0xff]  ;;  %vm342_vm1 = vcmask 171008   ;;  %v277_v12 = vld [vmem:[%s2390_s1] sm:$0xff]  ;;  %v300_v14 = vld [vmem:[%s2391_s2 + $0x30] sm:$0xff]  ;;  %s257_s28 = sand.u32 1, %s1525_s22   ;;  %s1334_s19 = sshll.u32 %s1596_s25, 7 }
  0x19   : > { %s1635_s17 = scalar_select %p267_p13, %s1596_s25, 1  ;;  %329 = vperm.xlu1 %1402, %v299_v1   ;;  %339 = vperm.xlu0 %1401, %v301_v2   ;;  %v294_v16 = vld [vmem:[%s2391_s2] sm:$0xff]  ;;  %v278_v17 = vld [vmem:[%s2390_s1 + $0x8] sm:$0xff]  ;;  %v279_v19 = vld [vmem:[%s2390_s1 + $0x10] sm:$0xff] }
  0x1a   : > { %1403 = vset.pattern.permute.xlu2 %v1536_v0  ;;  %v295_v18 = vld [vmem:[%s2391_s2 + $0x8] sm:$0xff]  ;;  %v280_v20 = vld [vmem:[%s2390_s1 + $0x18] sm:$0xff]  ;;  %v281_v22 = vld [vmem:[%s2390_s1 + $0x20] sm:$0xff]  ;;  %s1207_s29 = sshll.u32 %s257_s28, 7  ;;  %s1095_s10 = scalar_lea.hbm %s2394_s5, %s1334_s19 }
  0x1b   : > { %s1346_s18 = smul.u32 72, %s1635_s17  ;;  %v297_v21 = vld [vmem:[%s2391_s2 + $0x18] sm:$0xff]  ;;  %v296_v23 = vld [vmem:[%s2391_s2 + $0x10] sm:$0xff]  ;;  %v282_v24 = vld [vmem:[%s2390_s1 + $0x28] sm:$0xff]  ;;  %s1789_s9 = scalar_lea.vmem [#allocation5], %s1207_s29 }
  0x1c   : > { %319 = vperm.xlu2 %1403, %v297_v21   ;;  %v283_v25 = vld [vmem:[%s2390_s1 + $0x30] sm:$0xff]  ;;  %s1096_s20 = sshll.u32 %s1789_s9, 4  ;;  %s1098_s11 = sshll.u32 %s1095_s10, 4  ;;  %s1097_s20 = int_to_ptr.vmem [resolvable:$true] %s1096_s20  ;;  %s1099_s11 = int_to_ptr.hbm [resolvable:$true] %s1098_s11 }
  0x1d   : > { %s271_s26 = scalar_lea.vmem %s2389_s0, %s1346_s18  ;;  %s1079_s12 = scalar_lea.sflag [#allocation3], %s257_s28 }
  0x1e   : > { %v291_v3 = vld [vmem:[%s271_s26 + $0x30] sm:$0x1f]  ;;  %v288_v4 = vld [vmem:[%s271_s26 + $0x18] sm:$0xff]  ;;  %v285_v6 = vld [vmem:[%s271_s26] sm:$0xff]  ;;  %s1481_s13 = sshra.s32 %s1099_s11, 4  ;;  %s1487_s25 = scalar_lea.hbm %s2394_s5, 256  ;;  %s1482_s13 = int_to_ptr.hbm [resolvable:$true] %s1481_s13 }
  0x1f   : > { %1335 = vmatpush.msk.msra.mxu2 %vm367_vm0, %v291_v3  ;;  %1211 = vmatpush.msk.msra.mxu0 %vm367_vm0, %v291_v3  ;;  %v292_v7 = vld [vmem:[%s271_s26 + $0x38] sm:$0x1f]  ;;  %v289_v8 = vld [vmem:[%s271_s26 + $0x20] sm:$0xff]  ;;  %v286_v11 = vld [vmem:[%s271_s26 + $0x8] sm:$0xff]  ;;  %s1483_s14 = scalar_lea.hbm %s1482_s13, 128  ;;  %p1488_p3 = scmp.lt.s32.totalorder %s1482_s13, %s2394_s5 }
  0x20   : > { %1220 = vmatpush.msk.msra.mxu1 %vm367_vm0, %v292_v7  ;;  %v293_v10 = vld [vmem:[%s271_s26 + $0x40] sm:$0x1f]  ;;  %v290_v13 = vld [vmem:[%s271_s26 + $0x28] sm:$0xff]  ;;  %v287_v15 = vld [vmem:[%s271_s26 + $0x10] sm:$0xff]  ;;  %p1484_p0 = scmp.ne.s32.totalorder %s1482_s13, %s1483_s14  ;;  %p1489_p4 = scmp.lt.s32.totalorder %s1487_s25, %s1483_s14 }
  0x21   : > { %1336 = vmatpush.msra.mxu2 %v288_v4  ;;  %324 = vperm.xlu1 %1402, %v298_v5  }
  0x22   : > { %391 = vmatpush.msra.mxu0 %v288_v4  ;;  %432 = vmatpush.msra.mxu1 %v289_v8  ;;  %p1485_p1 = pnand %p1484_p0, %p1613_p5  ;;  %p1490_p7 = por %p1489_p4, %p1488_p3 }
  0x23   : > { %1337 = vmatpush.msra.mxu2 %v285_v6  ;;  %334 = vperm.xlu0 %1401, %v300_v14  }
  0x24   : > { %1219 = vmatmul.msk.f32.vlgmr.msra.gmra.mxu2 %vm342_vm1, %v284_v9  ;;  %392 = vmatpush.msra.mxu0 %v285_v6  ;;  %p1486_p2 = pneg %p1485_p1 }
  0x25   : > { %1229 = vmatpush.msk.msrb.mxu2 %vm367_vm0, %v293_v10  ;;  %433 = vmatpush.msra.mxu1 %v286_v11 }
  0x26   : > { %1221 = vmatmul.msk.f32.vlgmr.msra.gmra.mxu1 %vm342_vm1, %v277_v12  ;;  %1212 = vmatmul.msk.f32.vlgmr.msra.gmra.mxu0 %vm342_vm1, %v277_v12  ;;  %p1491_p8 = pnand %p1490_p7, %p1486_p2 }
  0x27   : > { %473 = vmatpush.msrb.mxu2 %v290_v13  ;;  %314 = vperm.xlu2 %1403, %v296_v23  }
  0x29   : > { %474 = vmatpush.msrb.mxu2 %v287_v15  ;;  %304 = vperm.xlu1 %1402, %v294_v16  }
  0x2b   : > { %309 = vperm.xlu0 %1401, %v295_v18  }
  0x2c   : > { %1230 = vmatmul.msk.f32.vlgmr.msrb.gmra.mxu2 %vm342_vm1, %v277_v12 }
  0x2e   : > { %1222 = vmatmul.msk.f32.gmra.mxu1 %vm342_vm1, %v278_v17  ;;  %1213 = vmatmul.msk.f32.gmra.mxu0 %vm342_vm1, %v278_v17 }
  0x34   : > { %1231 = vmatmul.msk.f32.gmra.mxu2 %vm342_vm1, %v278_v17 }
  0x36   : > { %1223 = vmatmul.msk.f32.gmra.mxu1 %vm342_vm1, %v279_v19  ;;  %1214 = vmatmul.msk.f32.gmra.mxu0 %vm342_vm1, %v279_v19 }
  0x3c   : > { %1232 = vmatmul.msk.f32.gmra.mxu2 %vm342_vm1, %v279_v19 }
  0x3e   : > { %1224 = vmatmul.msk.f32.gmra.mxu1 %vm342_vm1, %v280_v20  ;;  %1215 = vmatmul.msk.f32.gmra.mxu0 %vm342_vm1, %v280_v20 }
  0x44   : > { %1233 = vmatmul.msk.f32.gmra.mxu2 %vm342_vm1, %v280_v20 }
  0x46   : > { %1225 = vmatmul.msk.f32.gmra.mxu1 %vm342_vm1, %v281_v22  ;;  %1216 = vmatmul.msk.f32.gmra.mxu0 %vm342_vm1, %v281_v22 }
  0x4c   : > { %1234 = vmatmul.msk.f32.gmra.mxu2 %vm342_vm1, %v281_v22 }
  0x4e   : > { %1226 = vmatmul.msk.f32.gmra.mxu1 %vm342_vm1, %v282_v24  ;;  %1217 = vmatmul.msk.f32.gmra.mxu0 %vm342_vm1, %v282_v24 }
  0x54   : > { %1235 = vmatmul.msk.f32.gmra.mxu2 %vm342_vm1, %v282_v24 }
  0x56   : > { %1227 = vmatmul.msk.f32.gmra.mxu1 %vm342_vm1, %v283_v25  ;;  %1218 = vmatmul.msk.f32.gmra.mxu0 %vm342_vm1, %v283_v25 }
  0x5c   : > { %1236 = vmatmul.msk.f32.gmra.mxu2 %vm342_vm1, %v283_v25 }
  0x5e   : > { %1228 = vmatmul.msk.f32.gmra.mxu1 %vm342_vm1, %v284_v9 }
  0x64   : > { %1237 = vmatmul.msk.f32.gmra.mxu2 %vm342_vm1, %v284_v9 }
  0x76   : > { %v1721_v38 = vpop.permute.xlu2 %319 }
  0x81   : > { %v1727_v52 = vpop.permute.xlu2 %314 }
  0x8b   : > { %v1711_v26 = vpop.permute.xlu1 %329  ;;  %v1713_v27 = vpop.permute.xlu0 %339 }
  0x93   : > { %v1715_v28 = vpop.permute.xlu1 %324 }
  0x95   : > { %v1719_v31 = vpop.permute.xlu0 %334 }
  0x9b   : > { %v305_v32 = vpop.permute.xlu1 %304 }
  0x9d   : > { %v1723_v39 = vpop.permute.xlu0 %309 }
  0xa3   : > { %v435_v29 = vpop.f32.mrf.mxu1  ;;  %v394_v3 = vpop.f32.mrf.mxu0 }
  0xa4   : > { %v436_v34 = vadd.f32 %v435_v29, %v305_v32  ;;  %v1743_v17 = vadd.f32 %v394_v3, %v305_v32 }
  0xa6   : > { %v501_v36 = vmax.f32 %v436_v34, 0.0 }
  0xa7   : > { %v1717_v30 = vpop.f32.mrf.mxu2 }
  0xab   : > { %v438_v33 = vpop.f32.mrf.mxu1  ;;  %v397_v29 = vpop.f32.mrf.mxu0 }
  0xac   : > { %v439_v43 = vadd.f32 %v438_v33, %v1723_v39  ;;  %v2396_v33 = vmax.f32 %v1743_v17, 0.0  ;;  %v1754_v34 = vadd.f32 %v397_v29, %v1723_v39 }
  0xae   : > { %v504_v49 = vmax.f32 %v439_v43, 0.0 }
  0xaf   : > { %v476_v35 = vpop.f32.mrf.mxu2 }
  0xb0   : > { %v477_v37 = vadd.f32 %v476_v35, %v305_v32 }
  0xb2   : > { %v502_v40 = vmax.f32 %v477_v37, 0.0 }
  0xb3   : > { %v441_v41 = vpop.f32.mrf.mxu1 }
  0xb4   : > { %v524_v42 = vmax.f32 %v501_v36, %v502_v40  ;;  %v442_v55 = vadd.f32 %v441_v41, %v1727_v52 }
  0xb6   : > { %v532_v44 = vsub.f32 %v501_v36, %v524_v42  ;;  %v556_v45 = vsub.f32 %v502_v40, %v524_v42  ;;  %v507_v0 = vmax.f32 %v442_v55, 0.0 }
  0xb7   : > { %v479_v46 = vpop.f32.mrf.mxu2 }
  0xb8   : > { %v540_v47 = vmul.f32 1.442695, %v532_v44  ;;  %v564_v48 = vmul.f32 1.442695, %v556_v45  ;;  %v480_v50 = vadd.f32 %v479_v46, %v1723_v39 }
  0xba   : > { %1404 = vpow2.f32 %v540_v47  ;;  %v505_v51 = vmax.f32 %v480_v50, 0.0 }
  0xbb   : > { %1406 = vpow2.f32 %v564_v48  ;;  %v444_v53 = vpop.f32.mrf.mxu1 }
  0xbc   : > { %v525_v54 = vmax.f32 %v504_v49, %v505_v51  ;;  %v445_v6 = vadd.f32 %v444_v53, %v1721_v38 }
  0xbe   : > { %v533_v56 = vsub.f32 %v504_v49, %v525_v54  ;;  %v557_v57 = vsub.f32 %v505_v51, %v525_v54  ;;  %v510_v15 = vmax.f32 %v445_v6, 0.0 }
  0xbf   : > { %v482_v58 = vpop.f32.mrf.mxu2 }
  0xc0   : > { %v1730_v59 = vpop.eup %1404  ;;  %v542_v60 = vmul.f32 1.442695, %v533_v56  ;;  %v566_v61 = vmul.f32 1.442695, %v557_v57  ;;  %v483_v62 = vadd.f32 %v482_v58, %v1727_v52  ;;  %v708_v57 = vlaneseq }
  0xc1   : > { %v1733_v63 = vpop.eup %1406 }
  0xc2   : > { %v580_v1 = vadd.f32 %v1733_v63, %v1730_v59  ;;  %1408 = vpow2.f32 %v542_v60  ;;  %v508_v2 = vmax.f32 %v483_v62, 0.0 }
  0xc3   : > { %1410 = vpow2.f32 %v566_v61  ;;  %v447_v4 = vpop.f32.mrf.mxu1 }
  0xc4   : > { %1412 = vrcp.f32 %v580_v1  ;;  %v526_v5 = vmax.f32 %v507_v0, %v508_v2  ;;  %v597_v22 = vand.u32 2147483647, %v580_v1  ;;  %v448_v23 = vadd.f32 %v447_v4, %v1715_v28 }
  0xc5   : > { %v599_v25 = vand.u32 2147483648, %v580_v1  ;;  %vm593_vm3 = vweird.f32 %v580_v1 }
  0xc6   : > { %v534_v7 = vsub.f32 %v507_v0, %v526_v5  ;;  %v558_v8 = vsub.f32 %v508_v2, %v526_v5  ;;  %vm1756_vm4 = vcmp.eq.f32.partialorder %v597_v22, 8.507059e+37  ;;  %v513_v42 = vmax.f32 %v448_v23, 0.0 }
  0xc7   : > { %v485_v9 = vpop.f32.mrf.mxu2  ;;  %v600_v39 = vor.u32 1.1754944e-38, %v599_v25  ;;  %v2397_v0 = vmax.f32 %v1754_v34, 0.0 }
  0xc8   : > { %v1738_v10 = vpop.eup %1408  ;;  %v486_v11 = vadd.f32 %v485_v9, %v1721_v38  ;;  %v544_v13 = vmul.f32 1.442695, %v534_v7  ;;  %v568_v14 = vmul.f32 1.442695, %v558_v8 }
  0xc9   : > { %v1741_v12 = vpop.eup %1410 }
  0xca   : > { %v1413_v16 = vpop.eup %1412  ;;  %v1747_v18 = vadd.f32 %v1741_v12, %v1738_v10  ;;  %v511_v19 = vmax.f32 %v486_v11, 0.0  ;;  %1414 = vpow2.f32 %v544_v13  ;;  %v1797_v13 = vshrl.u32 %v708_v57, 7 }
  0xcb   : > { %v589_v20 = vmul.f32 %v1413_v16, %v580_v1  ;;  %v450_v21 = vpop.f32.mrf.mxu1  ;;  %vm594_vm2 = vweird.f32 %v1413_v16 }
  0xcc   : > { %1416 = vrcp.f32 %v1747_v18  ;;  %v527_v32 = vmax.f32 %v510_v15, %v511_v19  ;;  %vm595_vm5 = vmor %vm593_vm3, %vm594_vm2  ;;  %v612_v49 = vand.u32 2147483647, %v1747_v18  ;;  %v614_v50 = vand.u32 2147483648, %v1747_v18 }
  0xcd   : > { %v590_v24 = vsub.f32 1.0, %v589_v20  ;;  %1418 = vpow2.f32 %v568_v14  ;;  %v451_v53 = vadd.f32 %v450_v21, %v1711_v26  ;;  %vm608_vm6 = vweird.f32 %v1747_v18 }
  0xce   : > { %v535_v36 = vsub.f32 %v510_v15, %v527_v32  ;;  %v559_v37 = vsub.f32 %v511_v19, %v527_v32  ;;  %vm1784_vm8 = vcmp.eq.f32.partialorder %v612_v49, 8.507059e+37  ;;  %v615_v8 = vor.u32 1.1754944e-38, %v614_v50 }
  0xcf   : > { %v591_v35 = vmul.f32 %v1413_v16, %v590_v24  ;;  %v488_v40 = vpop.f32.mrf.mxu2  ;;  %v516_v9 = vmax.f32 %v451_v53, 0.0  ;;  %v1801_v20 = vand.u32 127, %v708_v57 }
  0xd0   : > { %v489_v43 = vadd.f32 %v488_v40, %v1715_v28  ;;  %v1761_v44 = vpop.eup %1414  ;;  %v546_v46 = vmul.f32 1.442695, %v535_v36  ;;  %v570_v47 = vmul.f32 1.442695, %v559_v37  ;;  %v1821_v37 = vadd.s32 120, %v1797_v13 }
  0xd1   : > { %v592_v45 = vadd.f32 %v1413_v16, %v591_v35 }
  0xd2   : > { %v1417_v48 = vpop.eup %1416  ;;  %v514_v51 = vmax.f32 %v489_v43, 0.0  ;;  %1420 = vpow2.f32 %v546_v46  ;;  %v1835_v46 = vadd.s32 104, %v1797_v13 }
  0xd3   : > { %v1769_v54 = vpop.eup %1418  ;;  %v596_v55 = vsel %vm595_vm5, %v1413_v16, %v592_v45  ;;  %v604_v56 = vmul.f32 %v1417_v48, %v1747_v18  ;;  %1422 = vpow2.f32 %v570_v47  ;;  %v453_v2 = vpop.f32.mrf.mxu1  ;;  %vm609_vm7 = vweird.f32 %v1417_v48 }
  0xd4   : > { %v1774_v58 = vsel %vm1756_vm4, %v600_v39, %v596_v55  ;;  %v1778_v60 = vadd.f32 %v1769_v54, %v1761_v44  ;;  %v528_v61 = vmax.f32 %v513_v42, %v514_v51  ;;  %vm610_vm9 = vmor %vm608_vm6, %vm609_vm7  ;;  %v454_v25 = vadd.f32 %v453_v2, %v1719_v31 }
  0xd5   : > { %v943_v62 = vmul.f32 %v1733_v63, %v1774_v58  ;;  %v605_v1 = vsub.f32 1.0, %v604_v56 }
  0xd6   : > { %1424 = vrcp.f32 %v1778_v60  ;;  %v536_v5 = vsub.f32 %v513_v42, %v528_v61  ;;  %v560_v6 = vsub.f32 %v514_v51, %v528_v61  ;;  %v627_v22 = vand.u32 2147483647, %v1778_v60 }
  0xd7   : > { %1275 = vst [vmem:[%s1789_s9 + $0x40] sm:$0xff] %v943_v62  ;;  %v1794_v63 = vmul.f32 %v943_v62, %v2396_v33  ;;  %v606_v4 = vmul.f32 %v1417_v48, %v605_v1  ;;  %v491_v7 = vpop.f32.mrf.mxu2  ;;  %v629_v23 = vand.u32 2147483648, %v1778_v60  ;;  %vm623_vm10 = vweird.f32 %v1778_v60 }
  0xd8   : > { %v492_v11 = vadd.f32 %v491_v7, %v1711_v26  ;;  %v1799_v14 = vpop.eup %1420  ;;  %v548_v16 = vmul.f32 1.442695, %v536_v5  ;;  %v572_v19 = vmul.f32 1.442695, %v560_v6  ;;  %v1828_v42 = vadd.s32 112, %v1797_v13  ;;  %v1859_v7 = vpop.f32.mrf.mxu0 }
  0xd9   : > { %v607_v15 = vadd.f32 %v1417_v48, %v606_v4  ;;  %v1803_v21 = vpop.eup %1422  ;;  %vm1830_vm11 = vcmp.eq.f32.partialorder %v627_v22, 8.507059e+37  ;;  %v630_v45 = vor.u32 1.1754944e-38, %v629_v23  ;;  %v519_v49 = vmax.f32 %v454_v25, 0.0 }
  0xda   : > { %v517_v24 = vmax.f32 %v492_v11, 0.0  ;;  %v1814_v32 = vadd.f32 %v1803_v21, %v1799_v14  ;;  %1426 = vpow2.f32 %v548_v16  ;;  %v1846_v62 = vadd.s32 1, %v1821_v37 }
  0xdb   : > { %v611_v29 = vsel %vm610_vm9, %v1417_v48, %v607_v15  ;;  %1428 = vpow2.f32 %v572_v19  ;;  %v456_v51 = vpop.f32.mrf.mxu1  ;;  %v1849_v1 = vadd.s32 1, %v1828_v42  ;;  %v1857_v5 = vadd.s32 1, %v1835_v46 }
  0xdc   : > { %v1425_v35 = vpop.eup %1424  ;;  %v1818_v18 = vsel %vm1784_vm8, %v615_v8, %v611_v29  ;;  %v529_v36 = vmax.f32 %v516_v9, %v517_v24  ;;  %1430 = vrcp.f32 %v1814_v32  ;;  %2428 = vst [vmem:[#allocation8_spill] sm:$0xff] %v1846_v62  ;;  %v1854_v4 = vadd.f32 %v456_v51, %v1713_v27 }
  0xdd   : > { %v944_v40 = vmul.f32 %v1741_v12, %v1818_v18  ;;  %v619_v41 = vmul.f32 %v1425_v35, %v1778_v60  ;;  %vm624_vm12 = vweird.f32 %v1425_v35  ;;  %2429 = vst [vmem:[#allocation9_spill] sm:$0xff] %v1849_v1  ;;  %vm791_vm13 = vcmp.eq.s32.totalorder %v1846_v62, %v1801_v20 }
  0xde   : > { %v537_v39 = vsub.f32 %v516_v9, %v529_v36  ;;  %v561_v48 = vsub.f32 %v517_v24, %v529_v36  ;;  %2430 = vst [vmem:[#allocation10_spill] sm:$0xff] %v1857_v5  ;;  %vm625_vm14 = vmor %vm623_vm10, %vm624_vm12  ;;  %vm638_vm15 = vweird.f32 %v1814_v32  ;;  %v2398_v16 = vmov 1.0  }
  0xdf   : > { %1276 = vst [vmem:[%s1789_s9 + $0x48] sm:$0xff] %v944_v40  ;;  %v1840_v12 = vmul.f32 %v944_v40, %v2397_v0  ;;  %v620_v47 = vsub.f32 1.0, %v619_v41  ;;  %v494_v50 = vpop.f32.mrf.mxu2  ;;  %1259 = vmatpush.msk.msrb.mxu0 %vm791_vm13, %v2398_v16  ;;  %vm790_vm0 = vcmp.eq.s32.totalorder %v1849_v1, %v1801_v20  ;;  %v644_v22 = vand.u32 2147483648, %v1814_v32 }
  0xe0   : > { %v550_v53 = vmul.f32 1.442695, %v537_v39  ;;  %v495_v55 = vadd.f32 %v494_v50, %v1719_v31  ;;  %v1843_v56 = vpop.eup %1426  ;;  %v574_v61 = vmul.f32 1.442695, %v561_v48  ;;  %v1881_v60 = vadd.s32 96, %v1797_v13 }
  0xe1   : > { %v621_v57 = vmul.f32 %v1425_v35, %v620_v47  ;;  %v1851_v2 = vpop.eup %1428  ;;  %v642_v25 = vand.u32 2147483647, %v1814_v32  ;;  %1260 = vmatpush.msk.msrb.mxu0 %vm790_vm0, %v2398_v16  ;;  %v522_v40 = vmax.f32 %v1854_v4, 0.0  ;;  %vm789_vm1 = vcmp.eq.s32.totalorder %v1857_v5, %v1801_v20 }
  0xe2   : > { %1432 = vpow2.f32 %v550_v53  ;;  %v520_v3 = vmax.f32 %v495_v55, 0.0  ;;  %v1431_v6 = vpop.eup %1430  ;;  %v1863_v9 = vadd.f32 %v1851_v2, %v1843_v56  ;;  %v645_v48 = vor.u32 1.1754944e-38, %v644_v22 }
  0xe3   : > { %v622_v8 = vadd.f32 %v1425_v35, %v621_v57  ;;  %1434 = vpow2.f32 %v574_v61  ;;  %v634_v11 = vmul.f32 %v1431_v6, %v1814_v32  ;;  %vm639_vm2 = vweird.f32 %v1431_v6  ;;  %1261 = vmatpush.msk.msrb.mxu0 %vm789_vm1, %v2398_v16  ;;  %v1937_v32 = vpop.f32.mrf.mxu0 }
  0xe4   : > { %v530_v15 = vmax.f32 %v519_v49, %v520_v3  ;;  %1436 = vrcp.f32 %v1863_v9  ;;  %v1911_v50 = vadd.s32 1, %v1881_v60  ;;  %v1914_v51 = vadd.s32 88, %v1797_v13  ;;  %vm640_vm3 = vmor %vm638_vm15, %vm639_vm2 }
  0xe5   : > { %v626_v19 = vsel %vm625_vm14, %v1425_v35, %v622_v8  ;;  %v635_v24 = vsub.f32 1.0, %v634_v11  ;;  %v1929_v4 = vadd.s32 80, %v1797_v13  ;;  %vm643_vm5 = vcmp.eq.f32.partialorder %v642_v25, 8.507059e+37 }
  0xe6   : > { %v1885_v23 = vsel %vm1830_vm11, %v630_v45, %v626_v19  ;;  %v538_v29 = vsub.f32 %v519_v49, %v530_v15  ;;  %v562_v36 = vsub.f32 %v520_v3, %v530_v15  ;;  %2431 = vst [vmem:[#allocation11_spill] sm:$0xff] %v1911_v50  ;;  %vm788_vm4 = vcmp.eq.s32.totalorder %v1911_v50, %v1801_v20 }
  0xe7   : > { %v1894_v35 = vmul.f32 %v1769_v54, %v1885_v23  ;;  %v497_v41 = vpop.f32.mrf.mxu2  ;;  %v636_v45 = vmul.f32 %v1431_v6, %v635_v24  ;;  %v1926_v3 = vadd.s32 1, %v1914_v51  ;;  %1262 = vmatpush.msk.msrb.mxu0 %vm788_vm4, %v2398_v16  ;;  %v659_v19 = vand.u32 2147483648, %v1863_v9 }
  0xe8   : > { %v1899_v43 = vpop.eup %1432  ;;  %v552_v39 = vmul.f32 1.442695, %v538_v29  ;;  %v498_v47 = vadd.f32 %v497_v41, %v1713_v27  ;;  %v576_v49 = vmul.f32 1.442695, %v562_v36  ;;  %vm653_vm7 = vweird.f32 %v1863_v9 }
  0xe9   : > { %v1906_v54 = vpop.eup %1434  ;;  %1277 = vst [vmem:[%s1789_s9 + $0x50] sm:$0xff] %v1894_v35  ;;  %v637_v53 = vadd.f32 %v1431_v6, %v636_v45  ;;  %vm787_vm6 = vcmp.eq.s32.totalorder %v1926_v3, %v1801_v20  ;;  %v657_v25 = vand.u32 2147483647, %v1863_v9  ;;  %v1955_v29 = vadd.s32 1, %v1929_v4 }
  0xea   : > { %v1918_v55 = vadd.f32 %v1906_v54, %v1899_v43  ;;  %1438 = vpow2.f32 %v552_v39  ;;  %v523_v57 = vmax.f32 %v498_v47, 0.0  ;;  %v1437_v61 = vpop.eup %1436  ;;  %2432 = vst [vmem:[#allocation12_spill] sm:$0xff] %v1926_v3  ;;  %1263 = vmatpush.msk.msrb.mxu0 %vm787_vm6, %v2398_v16 }
  0xeb   : > { %1440 = vpow2.f32 %v576_v49  ;;  %v641_v8 = vsel %vm640_vm3, %v1431_v6, %v637_v53  ;;  %v649_v11 = vmul.f32 %v1437_v61, %v1863_v9  ;;  %2433 = vst [vmem:[#allocation13_spill] sm:$0xff] %v1955_v29  ;;  %vm654_vm8 = vweird.f32 %v1437_v61 }
  0xec   : > { %1442 = vrcp.f32 %v1918_v55  ;;  %v1939_v15 = vsel %vm643_vm5, %v645_v48, %v641_v8  ;;  %v531_v24 = vmax.f32 %v522_v40, %v523_v57  ;;  %v660_v48 = vor.u32 1.1754944e-38, %v659_v19  ;;  %vm655_vm10 = vmor %vm653_vm7, %vm654_vm8 }
  0xed   : > { %v1944_v6 = vmul.f32 %v1803_v21, %v1939_v15  ;;  %v650_v22 = vsub.f32 1.0, %v649_v11  ;;  %v1958_v21 = vadd.s32 72, %v1797_v13  ;;  %vm786_vm9 = vcmp.eq.s32.totalorder %v1955_v29, %v1801_v20 }
  0xee   : > { %v539_v45 = vsub.f32 %v522_v40, %v531_v24  ;;  %v563_v39 = vsub.f32 %v523_v57, %v531_v24  ;;  %v1972_v53 = vadd.s32 64, %v1797_v13  ;;  %1264 = vmatpush.msk.msrb.mxu0 %vm786_vm9, %v2398_v16  ;;  %vm658_vm12 = vcmp.eq.f32.partialorder %v657_v25, 8.507059e+37  ;;  %v2006_v25 = vpop.f32.mrf.mxu0 }
  0xef   : > { %1278 = vst [vmem:[%s1789_s9 + $0x58] sm:$0xff] %v1944_v6  ;;  %v651_v41 = vmul.f32 %v1437_v61, %v650_v22  ;;  %v1969_v49 = vadd.s32 1, %v1958_v21  ;;  %vm668_vm14 = vweird.f32 %v1918_v55  ;;  %v2442_v29 = vmov 1.0  }
  0xf0   : > { %v1960_v36 = vpop.eup %1438  ;;  %v554_v40 = vmul.f32 1.442695, %v539_v45  ;;  %v578_v57 = vmul.f32 1.442695, %v563_v39  ;;  %v1988_v24 = vadd.s32 1, %v1972_v53 }
  0xf1   : > { %v1964_v47 = vpop.eup %1440  ;;  %2434 = vst [vmem:[#allocation14_spill] sm:$0xff] %v1969_v49  ;;  %v652_v11 = vadd.f32 %v1437_v61, %v651_v41  ;;  %vm785_vm11 = vcmp.eq.s32.totalorder %v1969_v49, %v1801_v20  ;;  %v1991_v41 = vadd.s32 56, %v1797_v13  ;;  %v672_v39 = vand.u32 2147483647, %v1918_v55 }
  0xf2   : > { %v1443_v8 = vpop.eup %1442  ;;  %v1976_v22 = vadd.f32 %v1964_v47, %v1960_v36  ;;  %2435 = vst [vmem:[#allocation15_spill] sm:$0xff] %v1988_v24  ;;  %1265 = vmatpush.msk.msrb.mxu0 %vm785_vm11, %v2398_v16  ;;  %vm784_vm15 = vcmp.eq.s32.totalorder %v1988_v24, %v1801_v20 }
  0xf3   : > { %v664_v19 = vmul.f32 %v1443_v8, %v1918_v55  ;;  %v656_v45 = vsel %vm655_vm10, %v1437_v61, %v652_v11  ;;  %v674_v61 = vand.u32 2147483648, %v1918_v55  ;;  %vm669_vm2 = vweird.f32 %v1443_v8 }
  0xf4   : > { %1444 = vrcp.f32 %v1976_v22  ;;  %v661_v9 = vsel %vm658_vm12, %v660_v48, %v656_v45  ;;  %1266 = vmatpush.msk.msrb.mxu0 %vm784_vm15, %v2398_v16  ;;  %v2013_v48 = vadd.s32 1, %v1991_v41  ;;  %vm2020_vm3 = vcmp.eq.f32.partialorder %v672_v39, 8.507059e+37  ;;  %vm670_vm7 = vmor %vm668_vm14, %vm669_vm2 }
  0xf5   : > { %v665_v33 = vsub.f32 1.0, %v664_v19  ;;  %1446 = vpow2.f32 %v554_v40  ;;  %v2001_v0 = vmul.f32 %v1851_v2, %v661_v9  ;;  %v2016_v2 = vadd.s32 48, %v1797_v13 }
  0xf6   : > { %1448 = vpow2.f32 %v578_v57  ;;  %2436 = vst [vmem:[#allocation16_spill] sm:$0xff] %v2013_v48  ;;  %v2028_v57 = vadd.s32 32, %v1797_v13  ;;  %v2031_v19 = vadd.s32 24, %v1797_v13  ;;  %vm783_vm5 = vcmp.eq.s32.totalorder %v2013_v48, %v1801_v20 }
  0xf7   : > { %v666_v11 = vmul.f32 %v1443_v8, %v665_v33  ;;  %1279 = vst [vmem:[%s1789_s9 + $0x60] sm:$0xff] %v2001_v0  ;;  %v2025_v33 = vadd.s32 40, %v1797_v13  ;;  %v2036_v16 = vadd.s32 1, %v2016_v2  ;;  %v2039_v39 = vadd.s32 16, %v1797_v13  ;;  %1267 = vmatpush.msk.msrb.mxu0 %vm783_vm5, %v2442_v29 }
  0xf8   : > { %2439 = vst [vmem:[#allocation17_spill] sm:$0xff] %v2031_v19  ;;  %v675_v49 = vor.u32 1.1754944e-38, %v674_v61  ;;  %v2051_v3 = vadd.s32 1, %v2028_v57  ;;  %v2054_v50 = vadd.s32 1, %v2031_v19  ;;  %v2062_v61 = vadd.s32 8, %v1797_v13 }
  0xf9   : > { %v667_v45 = vadd.f32 %v1443_v8, %v666_v11  ;;  %2440 = vst [vmem:[#allocation18_spill] sm:$0xff] %v2036_v16  ;;  %v2048_v11 = vadd.s32 1, %v2025_v33  ;;  %vm782_vm8 = vcmp.eq.s32.totalorder %v2036_v16, %v1801_v20  ;;  %v687_v19 = vand.u32 2147483647, %v1976_v22 }
  0xfa   : > { %2441 = vst [vmem:[#allocation19_spill] sm:$0xff] %v2039_v39  ;;  %v1445_v24 = vpop.eup %1444  ;;  %1268 = vmatpush.msk.msrb.mxu0 %vm782_vm8, %v2442_v29  ;;  %vm2419_vm12 = vcmp.eq.s32.totalorder %v2051_v3, %v1801_v20  ;;  %v689_v40 = vand.u32 2147483648, %v1976_v22  ;;  %vm2414_vm2 = vcmp.eq.s32.totalorder %v2054_v50, %v1801_v20 }
  0xfb   : > { %2443 = vst [vmem:[#allocation20_spill] sm:$0xff] %v2051_v3  ;;  %v2056_v5 = vpop.eup %1446  ;;  %v671_v1 = vsel %vm670_vm7, %v1443_v8, %v667_v45  ;;  %v679_v55 = vmul.f32 %v1445_v24, %v1976_v22  ;;  %vm2412_vm10 = vcmp.eq.s32.totalorder %v2048_v11, %v1801_v20  ;;  %vm684_vm14 = vweird.f32 %v1445_v24 }
  0xfc   : > { %v2064_v48 = vpop.eup %1448  ;;  %v676_v62 = vsel %vm2020_vm3, %v675_v49, %v671_v1  ;;  %v2083_v49 = vadd.s32 1, %v2039_v39  ;;  %1269 = vmatpush.msk.msrb.mxu0 %vm2412_vm10, %v2442_v29  ;;  %v2101_v39 = vadd.s32 1, %v2062_v61  ;;  %vm683_vm3 = vweird.f32 %v1976_v22 }
  0xfd   : > { %v2078_v8 = vmul.f32 %v1906_v54, %v676_v62  ;;  %v680_v45 = vsub.f32 1.0, %v679_v55  ;;  %v587_v1 = vadd.f32 %v2064_v48, %v2056_v5  ;;  %v2091_v54 = vmul.f32 %v1899_v43, %v676_v62  ;;  %vm685_vm10 = vmor %vm683_vm3, %vm684_vm14 }
  0xfe   : > { %v2094_v55 = vmul.f32 %v1843_v56, %v661_v9  ;;  %1270 = vmatpush.msk.msrb.mxu0 %vm2419_vm12, %v2442_v29  ;;  %v2108_v62 = vadd.s32 1, %v1797_v13  ;;  %v409_v56 = vpop.f32.mrf.mxu0  ;;  %vm2418_vm7 = vcmp.eq.s32.totalorder %v2083_v49, %v1801_v20  ;;  %v690_v9 = vor.u32 1.1754944e-38, %v689_v40 }
  0xff   : > { %1280 = vst [vmem:[%s1789_s9 + $0x68] sm:$0xff] %v2078_v8  ;;  %v681_v16 = vmul.f32 %v1445_v24, %v680_v45  ;;  %1450 = vrcp.f32 %v587_v1  ;;  %v2128_v22 = vmul.f32 %v1761_v44, %v1885_v23  ;;  %v811_v45 = vmul.f32 %v1738_v10, %v1818_v18 }
 0x100   : > { %2444 = vst [vmem:[#allocation21_spill] sm:$0xff] %v2108_v62  ;;  %1271 = vmatpush.msk.msrb.mxu0 %vm2414_vm2, %v2442_v29  ;;  %vm688_vm14 = vcmp.eq.f32.partialorder %v687_v19, 8.507059e+37  ;;  %vm2415_vm3 = vcmp.eq.s32.totalorder %v2101_v39, %v1801_v20  ;;  %vm2416_vm2 = vcmp.eq.s32.totalorder %v2108_v62, %v1801_v20  ;;  %v2445_v18 = vmax.f32 %v1754_v34, 0.0 }
 0x101   : > { %823 = vst [vmem:[%s1789_s9 + $0x28] sm:$0xff] %v2091_v54  ;;  %v682_v43 = vadd.f32 %v1445_v24, %v681_v16  ;;  %v2124_v16 = vmul.f32 %v1799_v14, %v1939_v15 }
 0x102   : > { %822 = vst [vmem:[%s1789_s9 + $0x20] sm:$0xff] %v2094_v55  ;;  %1272 = vmatpush.msk.msrb.mxu0 %vm2418_vm7, %v2442_v29  ;;  %v2148_v23 = vmul.f32 %v811_v45, %v2445_v18 }
 0x103   : > { %v686_v3 = vsel %vm685_vm10, %v1445_v24, %v682_v43  ;;  %821 = vst [vmem:[%s1789_s9 + $0x18] sm:$0xff] %v2124_v16  ;;  %v416_v24 = vadd.f32 %v1717_v30, %v1713_v27  ;;  %v404_v27 = vadd.f32 %v1937_v32, %v1721_v38  ;;  %v407_v30 = vadd.f32 %v2006_v25, %v1715_v28 }
 0x104   : > { %v691_v40 = vsel %vm688_vm14, %v690_v9, %v686_v3  ;;  %820 = vst [vmem:[%s1789_s9 + $0x10] sm:$0xff] %v2128_v22  ;;  %v2152_v3 = vmul.f32 %v1730_v59, %v1774_v58  ;;  %1273 = vmatpush.msk.msrb.mxu0 %vm2415_vm3, %v2442_v29  ;;  %v702_v58 = vand.u32 2147483647, %v587_v1  ;;  %vm698_vm14 = vweird.f32 %v587_v1 }
 0x105   : > { %v1451_v10 = vpop.eup %1450  ;;  %v949_v44 = vmul.f32 %v1964_v47, %v691_v40  ;;  %v816_v14 = vmul.f32 %v1960_v36, %v691_v40  ;;  %819 = vst [vmem:[%s1789_s9 + $0x8] sm:$0xff] %v811_v45  ;;  %v704_v36 = vand.u32 2147483648, %v587_v1  ;;  %v521_v18 = vmax.f32 %v416_v24, 0.0 }
 0x106   : > { %v694_v15 = vmul.f32 %v1451_v10, %v587_v1  ;;  %1274 = vmatpush.msk.msrb.mxu0 %vm2416_vm2, %v2442_v29  ;;  %818 = vst [vmem:[%s1789_s9] sm:$0xff] %v2152_v3  ;;  %vm699_vm10 = vweird.f32 %v1451_v10  ;;  %v412_v47 = vpop.f32.mrf.mxu0  ;;  %vm703_vm2 = vcmp.eq.f32.partialorder %v702_v58, 8.507059e+37 }
 0x107   : > { %1281 = vst [vmem:[%s1789_s9 + $0x70] sm:$0xff] %v949_v44  ;;  %vm700_vm3 = vmor %vm698_vm14, %vm699_vm10  ;;  %v705_v43 = vor.u32 1.1754944e-38, %v704_v36  ;;  %v413_v9 = vadd.f32 %v412_v47, %v1719_v31  ;;  %v2465_v47 = vld [vmem:[#allocation21_spill] sm:$0xff] }
 0x108   : > { %v695_v34 = vsub.f32 1.0, %v694_v15  ;;  %824 = vst [vmem:[%s1789_s9 + $0x30] sm:$0xff] %v816_v14  ;;  %v410_v15 = vadd.f32 %v409_v56, %v1711_v26  ;;  %v512_v56 = vmax.f32 %v407_v30, 0.0 }
 0x109   : > { %v518_v1 = vmax.f32 %v413_v9, 0.0 }
 0x10a   : > { %v696_v59 = vmul.f32 %v1451_v10, %v695_v34  ;;  %v964_v25 = vmul.f32 %v2001_v0, %v512_v56  ;;  %v2446_v0 = vmax.f32 %v1743_v17, 0.0  ;;  %v1285_v17 = vld [vmem:[%s2392_s3 + $0x38] sm:$0xff] }
 0x10b   : > { %v966_v26 = vmul.f32 %v949_v44, %v518_v1 }
 0x10c   : > { %v697_v19 = vadd.f32 %v1451_v10, %v696_v59  ;;  %v515_v59 = vmax.f32 %v410_v15, 0.0 }
 0x10e   : > { %v701_v45 = vsel %vm700_vm3, %v1451_v10, %v697_v19  ;;  %v401_v10 = vadd.f32 %v1859_v7, %v1727_v52  ;;  %v965_v38 = vmul.f32 %v2078_v8, %v515_v59  ;;  %v831_v28 = vmul.f32 %v2091_v54, %v515_v59 }
 0x10f   : > { %v706_v40 = vsel %vm703_vm2, %v705_v43, %v701_v45  ;;  %v830_v52 = vmul.f32 %v2094_v55, %v512_v56  ;;  %vm839_vm2 = vcmask 523264   ;;  %v727_v55 = vadd.s32 1, %v1801_v20 }
 0x110   : > { %v817_v34 = vmul.f32 %v2056_v5, %v706_v40  ;;  %v950_v62 = vmul.f32 %v2064_v48, %v706_v40  ;;  %v832_v5 = vmul.f32 %v816_v14, %v518_v1  ;;  %v509_v48 = vmax.f32 %v404_v27, 0.0 }
 0x111   : > { %v506_v32 = vmax.f32 %v401_v10, 0.0  ;;  %vm743_vm3 = vcmp.eq.s32.totalorder %v1821_v37, %v727_v55  ;;  %vm742_vm10 = vcmp.eq.s32.totalorder %v1828_v42, %v727_v55  ;;  %vm741_vm14 = vcmp.eq.s32.totalorder %v1835_v46, %v727_v55  ;;  %v1286_v37 = vld [vmem:[%s2392_s3 + $0x40] sm:$0xff]  ;;  %v836_v42 = vld [vmem:[%s2392_s3 + $0x10] sm:$0xff]  ;;  %v1287_v46 = vld [vmem:[%s2392_s3 + $0x48] sm:$0xff] }
 0x112   : > { %825 = vst [vmem:[%s1789_s9 + $0x38] sm:$0xff] %v817_v34  ;;  %v833_v36 = vmul.f32 %v817_v34, %v521_v18  ;;  %v967_v31 = vmul.f32 %v950_v62, %v521_v18  ;;  %v963_v7 = vmul.f32 %v1944_v6, %v509_v48  ;;  %v826_v6 = vmul.f32 %v2152_v3, %v2446_v0  ;;  %v2460_v3 = vld [vmem:[#allocation20_spill] sm:$0xff] }
 0x113   : > { %1282 = vst [vmem:[%s1789_s9 + $0x78] sm:$0xff] %v950_v62  ;;  %v829_v62 = vmul.f32 %v2124_v16, %v509_v48  ;;  %v962_v8 = vmul.f32 %v1894_v35, %v506_v32  ;;  %v828_v54 = vmul.f32 %v2128_v22, %v506_v32  ;;  %v834_v35 = vld [vmem:[%s2392_s3] sm:$0xff]  ;;  %1293 = vmatpush.msk.msra.mxu2 %vm743_vm3, %v2442_v29 }
 0x114   : > { %863 = vmatpush.msra.mxu3 %v833_v36  ;;  %997 = vmatpush.msra.mxu0 %v967_v31  ;;  %vm740_vm7 = vcmp.eq.s32.totalorder %v1881_v60, %v727_v55  ;;  %vm737_vm12 = vcmp.eq.s32.totalorder %v1958_v21, %v727_v55  ;;  %v838_v60 = vld [vmem:[%s2392_s3 + $0x20] sm:$0xff] }
 0x115   : > { %1338 = vmatpush.msrb.mxu1 %v967_v31  ;;  %1294 = vmatpush.msk.msra.mxu2 %vm742_vm10, %v2442_v29 }
 0x116   : > { %864 = vmatpush.msra.mxu3 %v832_v5  ;;  %998 = vmatpush.msra.mxu0 %v966_v26 }
 0x117   : > { %1339 = vmatpush.msrb.mxu1 %v966_v26  ;;  %1295 = vmatpush.msk.msra.mxu2 %vm741_vm14, %v2442_v29 }
 0x118   : > { %865 = vmatpush.msra.mxu3 %v831_v28  ;;  %999 = vmatpush.msra.mxu0 %v965_v38 }
 0x119   : > { %1340 = vmatpush.msrb.mxu1 %v965_v38  ;;  %1296 = vmatpush.msk.msra.mxu2 %vm740_vm7, %v2442_v29 }
 0x11a   : > { %866 = vmatpush.msra.mxu3 %v830_v52  ;;  %1000 = vmatpush.msra.mxu0 %v964_v25 }
 0x11b   : > { %1341 = vmatpush.msrb.mxu1 %v964_v25 }
 0x11c   : > { %867 = vmatpush.msra.mxu3 %v829_v62  ;;  %1001 = vmatpush.msra.mxu0 %v963_v7 }
 0x11d   : > { %1342 = vmatpush.msrb.mxu1 %v963_v7 }
 0x11e   : > { %868 = vmatpush.msra.mxu3 %v828_v54  ;;  %1002 = vmatpush.msra.mxu0 %v962_v8 }
 0x11f   : > { %1343 = vmatpush.msrb.mxu1 %v962_v8 }
 0x120   : > { %869 = vmatpush.msra.mxu3 %v2148_v23  ;;  %1003 = vmatpush.msra.mxu0 %v1840_v12 }
 0x121   : > { %1344 = vmatpush.msrb.mxu1 %v1840_v12  ;;  %v837_v12 = vld [vmem:[%s2392_s3 + $0x18] sm:$0xff] }
 0x122   : > { %870 = vmatpush.msra.mxu3 %v826_v6  ;;  %1004 = vmatpush.msra.mxu0 %v1794_v63 }
 0x123   : > { %1345 = vmatpush.msrb.mxu1 %v1794_v63  ;;  %1238 = vmatmul.msk.f32.vlgmr.msra.gmra.mxu3 %vm839_vm2, %v834_v35  ;;  %v835_v63 = vld [vmem:[%s2392_s3 + $0x8] sm:$0xff] }
 0x124   : > { %1290 = vmatmul.msk.f32.vlgmr.msrb.gmra.mxu1 %vm839_vm2, %v1285_v17  ;;  %1243 = vmatpush.msk.msrb.mxu3 %vm743_vm3, %v2442_v29  ;;  %vm739_vm3 = vcmp.eq.s32.totalorder %v1914_v51, %v727_v55  ;;  %v2447_v51 = vld [vmem:[#allocation17_spill] sm:$0xff] }
 0x125   : > { %1297 = vmatpush.msk.msra.mxu2 %vm739_vm3, %v2442_v29 }
 0x126   : > { %1244 = vmatpush.msk.msrb.mxu3 %vm742_vm10, %v2442_v29  ;;  %vm738_vm10 = vcmp.eq.s32.totalorder %v1929_v4, %v727_v55  ;;  %v2448_v4 = vld [vmem:[#allocation19_spill] sm:$0xff] }
 0x127   : > { %1298 = vmatpush.msk.msra.mxu2 %vm738_vm10, %v2442_v29 }
 0x128   : > { %1245 = vmatpush.msk.msrb.mxu3 %vm741_vm14, %v2442_v29  ;;  %vm736_vm14 = vcmp.eq.s32.totalorder %v1972_v53, %v727_v55 }
 0x129   : > { %1299 = vmatpush.msk.msra.mxu2 %vm737_vm12, %v2442_v29 }
 0x12a   : > { %1246 = vmatpush.msk.msrb.mxu3 %vm740_vm7, %v2442_v29  ;;  %vm735_vm7 = vcmp.eq.s32.totalorder %v1991_v41, %v727_v55 }
 0x12b   : > { %1239 = vmatmul.msk.f32.gmra.mxu3 %vm839_vm2, %v835_v63  ;;  %1300 = vmatpush.msk.msra.mxu2 %vm736_vm14, %v2442_v29 }
 0x12c   : > { %1291 = vmatmul.msk.f32.gmra.mxu1 %vm839_vm2, %v1286_v37  ;;  %1247 = vmatpush.msk.msrb.mxu3 %vm739_vm3, %v2442_v29  ;;  %vm734_vm3 = vcmp.eq.s32.totalorder %v2016_v2, %v727_v55 }
 0x12d   : > { %1301 = vmatpush.msk.msra.mxu2 %vm735_vm7, %v2442_v29 }
 0x12e   : > { %1248 = vmatpush.msk.msrb.mxu3 %vm738_vm10, %v2442_v29  ;;  %vm732_vm10 = vcmp.eq.s32.totalorder %v2028_v57, %v727_v55 }
 0x12f   : > { %1302 = vmatpush.msk.msra.mxu2 %vm734_vm3, %v2442_v29 }
 0x130   : > { %1249 = vmatpush.msk.msrb.mxu3 %vm737_vm12, %v2442_v29  ;;  %vm733_vm12 = vcmp.eq.s32.totalorder %v2025_v33, %v727_v55 }
 0x131   : > { %1303 = vmatpush.msk.msra.mxu2 %vm733_vm12, %v2442_v29 }
 0x132   : > { %1250 = vmatpush.msk.msrb.mxu3 %vm736_vm14, %v2442_v29  ;;  %vm731_vm14 = vcmp.eq.s32.totalorder %v2447_v51, %v727_v55 }
 0x133   : > { %1240 = vmatmul.msk.f32.gmra.mxu3 %vm839_vm2, %v836_v42  ;;  %1304 = vmatpush.msk.msra.mxu2 %vm732_vm10, %v2442_v29 }
 0x134   : > { %1292 = vmatmul.msk.f32.gmra.mxu1 %vm839_vm2, %v1287_v46  ;;  %1251 = vmatpush.msk.msrb.mxu3 %vm735_vm7, %v2442_v29  ;;  %vm730_vm7 = vcmp.eq.s32.totalorder %v2448_v4, %v727_v55 }
 0x135   : > { %1305 = vmatpush.msk.msra.mxu2 %vm731_vm14, %v2442_v29 }
 0x136   : > { %1252 = vmatpush.msk.msrb.mxu3 %vm734_vm3, %v2442_v29  ;;  %vm729_vm3 = vcmp.eq.s32.totalorder %v2062_v61, %v727_v55 }
 0x137   : > { %1306 = vmatpush.msk.msra.mxu2 %vm730_vm7, %v2442_v29 }
 0x138   : > { %1253 = vmatpush.msk.msrb.mxu3 %vm733_vm12, %v2442_v29  ;;  %vm728_vm12 = vcmp.eq.s32.totalorder %v1797_v13, %v727_v55 }
 0x139   : > { %1307 = vmatpush.msk.msra.mxu2 %vm729_vm3, %v2442_v29 }
 0x13a   : > { %1254 = vmatpush.msk.msrb.mxu3 %vm732_vm10, %v2442_v29 }
 0x13b   : > { %1241 = vmatmul.msk.f32.gmra.mxu3 %vm839_vm2, %v837_v12  ;;  %1308 = vmatpush.msk.msra.mxu2 %vm728_vm12, %v2442_v29 }
 0x13c   : > { %1255 = vmatpush.msk.msrb.mxu3 %vm731_vm14, %v2442_v29 }
 0x13e   : > { %1256 = vmatpush.msk.msrb.mxu3 %vm730_vm7, %v2442_v29 }
 0x140   : > { %1257 = vmatpush.msk.msrb.mxu3 %vm729_vm3, %v2442_v29 }
 0x142   : > { %1258 = vmatpush.msk.msrb.mxu3 %vm728_vm12, %v2442_v29 }
 0x143   : > { %1242 = vmatmul.msk.f32.gmra.mxu3 %vm839_vm2, %v838_v60 }
 0x144   : > { %1309 = vmatpush.msk.msra.mxu3 %vm791_vm13, %v2442_v29  ;;  %vm2459_vm13 = vcmp.eq.s32.totalorder %v2048_v11, %v1801_v20 }
 0x146   : > { %1310 = vmatpush.msk.msra.mxu3 %vm790_vm0, %v2442_v29  ;;  %vm2461_vm0 = vcmp.eq.s32.totalorder %v2460_v3, %v1801_v20 }
 0x148   : > { %1311 = vmatpush.msk.msra.mxu3 %vm789_vm1, %v2442_v29  ;;  %vm2462_vm1 = vcmp.eq.s32.totalorder %v2054_v50, %v1801_v20 }
 0x14a   : > { %1312 = vmatpush.msk.msra.mxu3 %vm788_vm4, %v2442_v29  ;;  %vm2463_vm4 = vcmp.eq.s32.totalorder %v2083_v49, %v1801_v20 }
 0x14c   : > { %1313 = vmatpush.msk.msra.mxu3 %vm787_vm6, %v2442_v29  ;;  %vm2464_vm6 = vcmp.eq.s32.totalorder %v2101_v39, %v1801_v20  ;;  %v1283_v39 = vld [vmem:[%s2392_s3 + $0x28] sm:$0xff] }
 0x14e   : > { %1314 = vmatpush.msk.msra.mxu3 %vm786_vm9, %v2442_v29  ;;  %vm2466_vm9 = vcmp.eq.s32.totalorder %v2465_v47, %v1801_v20  ;;  %v1284_v20 = vld [vmem:[%s2392_s3 + $0x30] sm:$0xff] }
 0x150   : > { %1315 = vmatpush.msk.msra.mxu3 %vm785_vm11, %v2442_v29 }
 0x152   : > { %1316 = vmatpush.msk.msra.mxu3 %vm784_vm15, %v2442_v29 }
 0x154   : > { %1317 = vmatpush.msk.msra.mxu3 %vm783_vm5, %v2442_v29 }
 0x156   : > { %1318 = vmatpush.msk.msra.mxu3 %vm782_vm8, %v2442_v29 }
 0x158   : > { %1319 = vmatpush.msk.msra.mxu3 %vm2459_vm13, %v2442_v29 }
 0x15a   : > { %1320 = vmatpush.msk.msra.mxu3 %vm2461_vm0, %v2442_v29 }
 0x15c   : > { %1321 = vmatpush.msk.msra.mxu3 %vm2462_vm1, %v2442_v29 }
 0x15e   : > { %1322 = vmatpush.msk.msra.mxu3 %vm2463_vm4, %v2442_v29 }
 0x160   : > { %1323 = vmatpush.msk.msra.mxu3 %vm2464_vm6, %v2442_v29 }
 0x162   : > { %1324 = vmatpush.msk.msra.mxu3 %vm2466_vm9, %v2442_v29 }
 0x1a1   : > { %v1012_v22 = vpop.f32.mrf.mxu1 }
 0x1a2   : > { %1037 = vmatmul.f32.vlgmr.msra.gmra.mxu2 %v1012_v22 }
 0x1a6   : > { %v872_v23 = vpop.f32.mrf.mxu3 }
 0x1a9   : > { %v1015_v58 = vpop.f32.mrf.mxu1 }
 0x1aa   : > { %1040 = vmatmul.f32.gmra.mxu2 %v1015_v58 }
 0x1ae   : > { %v875_v11 = vpop.f32.mrf.mxu3 }
 0x1b1   : > { %v1018_v49 = vpop.f32.mrf.mxu1 }
 0x1b6   : > { %v878_v50 = vpop.f32.mrf.mxu3 }
 0x1b7   : > { %903 = vmatmul.f32.vlgmr.msrb.gmra.mxu3 %v878_v50 }
 0x1be   : > { %v881_v24 = vpop.f32.mrf.mxu3 }
 0x1bf   : > { %906 = vmatmul.f32.gmra.mxu3 %v881_v24 }
 0x1c6   : > { %v884_v19 = vpop.f32.mrf.mxu3 }
 0x1c7   : > { %926 = vmatmul.f32.vlgmr.msrb.gmra.mxu0 %v884_v19  ;;  %1060 = vmatmul.f32.vlgmr.msra.gmra.mxu3 %v1018_v49 }
 0x1cf   : > { %1288 = vmatmul.msk.f32.vlgmr.msra.gmra.mxu0 %vm839_vm2, %v1283_v39 }
 0x1d7   : > { %1289 = vmatmul.msk.f32.gmra.mxu0 %vm839_vm2, %v1284_v20 }
 0x1d8   : > { %1494 = shalt.err (!%p1491_p8)
}
 0x1d9   : > { %s1538_s28 = smov 128   ;;  %s1539_s19 = smov 8   ;;  %vm808_vm11 = vcmp.eq.s32.totalorder %v1797_v13, 0 }
 0x1da   : > { %1351 = dma.vmem_to_hbm [thread:$0]  (%p1613_p5), %s1097_s20, 2048, %s1099_s11, %s1079_s12, %s1538_s28, %s1538_s28, %s1539_s19  }
 0x1db   : > { %s937_s26 = sld [smem:[#allocation2]]  ;;  %s1333_s29 = sshll.u32 %s1635_s17, 5 }
 0x1dc   : > { %s276_s13 = scalar_lea.vmem %s2395_s6, %s1333_s29  ;;  %s1325_s14 = sld [smem:[#allocation2 + $0x1]] }
 0x1e1   : > { %v938_v9 = vstv %s937_s26 }
 0x1e2   : > { %v1072_v48 = vstv %s1325_s14 }
 0x225   : > { %v1038_v31 = vpop.f32.mrf.mxu2 }
 0x22d   : > { %v1041_v28 = vpop.f32.mrf.mxu2 }
 0x23a   : > { %v904_v29 = vpop.f32.mrf.mxu3 }
 0x23b   : > { %v930_v34 = vadd.f32 %v904_v29, %v872_v23 }
 0x242   : > { %v907_v43 = vpop.f32.mrf.mxu3 }
 0x243   : > { %v931_v45 = vadd.f32 %v907_v43, %v875_v11 }
 0x244   : > { %v927_v40 = vpop.f32.mrf.mxu0 }
 0x245   : > { %v940_v18 = vadd.f32 %v938_v9, %v931_v45  ;;  %v932_v15 = vperm.slane %v927_v40, 0 }
 0x247   : > { %942 = vst [vmem:[%s276_s13 + $0x8] sm:$0x3] %v940_v18  ;;  %v933_v27 = vsel %vm808_vm11, %v932_v15, 0.0 }
 0x248   : > { %v935_v30 = vadd.f32 %v933_v27, %v930_v34 }
 0x24a   : > { %v939_v1 = vadd.f32 %v938_v9, %v935_v30  ;;  %v1061_v36 = vpop.f32.mrf.mxu3 }
 0x24b   : > { %v1066_v10 = vperm.slane %v1061_v36, 0 }
 0x24c   : > { %941 = vst [vmem:[%s276_s13] sm:$0xff] %v939_v1  ;;  %v1006_v59 = vpop.f32.mrf.mxu0 }
 0x24d   : > { %v1067_v26 = vsel %vm808_vm11, %v1066_v10, 0.0  ;;  %v1064_v5 = vadd.f32 %v1038_v31, %v1006_v59 }
 0x24f   : > { %v1069_v56 = vadd.f32 %v1067_v26, %v1064_v5 }
 0x251   : > { %v1073_v38 = vadd.f32 %v1072_v48, %v1069_v56 }
 0x253   : > { %1326 = vst [vmem:[%s276_s13 + $0x10] sm:$0xff] %v1073_v38 }
 0x254   : > { %v1009_v13 = vpop.f32.mrf.mxu0 }
 0x255   : > { %v1065_v32 = vadd.f32 %v1041_v28, %v1009_v13 }
 0x257   : > { %v1074_v25 = vadd.f32 %v1072_v48, %v1065_v32 }
 0x259   : > { %1327 = vst [vmem:[%s276_s13 + $0x18] sm:$0x3] %v1074_v25 }
 0x25a PF: > { %p1363_p5 = scmp.ge.s32.totalorder %s1533_s24, 2  ;;  %s1116_s7 = sand.u32 1, %s1521_s21  }
 0x25b   : > { %s1117_s17 = scalar_lea.sflag [#allocation3], %s1116_s7 }
 0x25c   : > { %p1358_p9 = pnand %p1363_p5, %p1617_p6 }
 0x25e   : > { %p1359_p10 = pneg %p1358_p9 }
 0x260   : > { %1516 = dma.done.wait (%p1359_p10), %s1117_s17, 2048  }
 0x261   : > { %1518 = vsyncadd (%p1359_p10), %s1117_s17, 4294965248  ;;  %p18_p11 = scmp.ge.s32.totalorder %s1600_s27, 4   ;;  %s2467_s21 = smov %s1525_s22 }
 0x262   : > { %s2468_s22 = smov %s1529_s23  ;;  %s2469_s23 = smov %s1611_s30 }
 0x263   : > { %s2470_s24 = smov %s1600_s27  ;;  %20 = sbr.rel (!%p18_p11) target bundleno = 4 (0x4), region = 95 }
 0x268   :  { %1131 = vsyncpa [#allocation3], 1 }
 0x269   :  { %1133 = vsyncpa [#allocation3 + $0x1], 1 }
 0x26a   :  { %1134 = vsyncpa [#allocation4], 1 }
 0x26b   :  { %1136 = vsyncpa [#allocation4 + $0x1], 1 }

</bundles_post_ra>
